<compile_context>
chip_gen: v7x
topology: tpu7x:2x2x1
jax: 0.10.0
libtpu: 0.0.40
codegen_flags: <defaults>
</compile_context>

<pallas_src>
import jax
import jax.numpy as jnp
from jax import lax
from jax.experimental import pallas as pl
from jax.experimental.pallas import tpu as pltpu


def _round_up(x, m):
    return ((x + m - 1) // m) * m


def _rpn_kernel(p_ref, w1_ref, b1_ref, w2_ref, b2_ref, o_ref):
    # p_ref : (1, tm, K)        im2col patches for one (batch, M-tile)
    # w1_ref: (K, Cmid_p)       3x3 conv weight, reshaped + channel-padded
    # b1_ref: (1, Cmid_p)
    # w2_ref: (Cmid_p, Cout_p)  fused [cls | bbox] 1x1 weights, padded to 128
    # b2_ref: (1, Cout_p)
    # o_ref : (1, tm, Cout_p)   lane-dense output slab
    patches = p_ref[0]                                   # (tm, K)
    mid = jnp.dot(patches, w1_ref[...],
                  preferred_element_type=jnp.float32) + b1_ref[...]
    out = jnp.dot(mid, w2_ref[...],
                  preferred_element_type=jnp.float32) + b2_ref[...]
    o_ref[0] = out.astype(o_ref.dtype)


def rpn_forward(x_nchw, params, tm=None):
    """Pallas RPN forward. x_nchw: (N, Cin, H, W) f32. Returns (logits, bbox) in NCHW."""
    wconv, bconv, wcls, bcls, wbox, bbox_b = params
    N, Cin, H, W = x_nchw.shape
    Cmid = wconv.shape[3]
    Ccls = wcls.shape[1]
    Cbox = wbox.shape[1]
    K = 9 * Cin
    M = H * W

    # ---- wrapper-side im2col (single fused XLA pass) -------------------------
    x_nhwc = jnp.transpose(x_nchw, (0, 2, 3, 1))
    x_pad = jnp.pad(x_nhwc, ((0, 0), (1, 1), (1, 1), (0, 0)))
    taps = [x_pad[:, ky:ky + H, kx:kx + W, :] for ky in range(3) for kx in range(3)]
    patches = jnp.concatenate(taps, axis=-1).reshape(N, M, K)   # (N, H*W, 9*Cin)

    # ---- weight prep: fuse heads, pad channels to multiples of 128 -----------
    Cmid_p = _round_up(Cmid, 128)
    Cout = Ccls + Cbox
    Cout_p = _round_up(Cout, 128)

    w1 = wconv.reshape(K, Cmid)                                  # (ky,kx,cin) row order == tap order
    w1p = jnp.pad(w1, ((0, 0), (0, Cmid_p - Cmid)))
    b1p = jnp.pad(bconv.reshape(1, Cmid), ((0, 0), (0, Cmid_p - Cmid)))

    w2 = jnp.concatenate([wcls, wbox], axis=1)                   # (Cmid, Ccls+Cbox)
    w2p = jnp.pad(w2, ((0, Cmid_p - Cmid), (0, Cout_p - Cout)))
    b2 = jnp.concatenate([bcls.reshape(1, -1), bbox_b.reshape(1, -1)], axis=1)
    b2p = jnp.pad(b2, ((0, 0), (0, Cout_p - Cout)))

    # ---- M tiling (keeps VMEM bounded at realistic feature-map sizes) --------
    if tm is None:
        tm = min(512, _round_up(M, 8))
    Mp = _round_up(M, tm)
    if Mp != M:
        patches = jnp.pad(patches, ((0, 0), (0, Mp - M), (0, 0)))
    num_m = Mp // tm

    out = pl.pallas_call(
        _rpn_kernel,
        out_shape=jax.ShapeDtypeStruct((N, Mp, Cout_p), jnp.float32),
        grid=(N, num_m),
        in_specs=[
            pl.BlockSpec((1, tm, K), lambda n, m: (n, m, 0)),
            pl.BlockSpec((K, Cmid_p), lambda n, m: (0, 0)),
            pl.BlockSpec((1, Cmid_p), lambda n, m: (0, 0)),
            pl.BlockSpec((Cmid_p, Cout_p), lambda n, m: (0, 0)),
            pl.BlockSpec((1, Cout_p), lambda n, m: (0, 0)),
        ],
        out_specs=pl.BlockSpec((1, tm, Cout_p), lambda n, m: (n, m, 0)),
        compiler_params=pltpu.CompilerParams(
            dimension_semantics=("parallel", "parallel")),
    )(patches, w1p, b1p, w2p, b2p)

    # ---- split fused heads, back to NCHW --------------------------------------
    out = out[:, :M, :]
    logits = out[:, :, :Ccls].reshape(N, H, W, Ccls)
    bbox = out[:, :, Ccls:Ccls + Cbox].reshape(N, H, W, Cbox)
    return jnp.transpose(logits, (0, 3, 1, 2)), jnp.transpose(bbox, (0, 3, 1, 2))


def _reference_forward(x_nchw, params):
    """Pure-JAX reference (lax.conv) for correctness check."""
    wconv, bconv, wcls, bcls, wbox, bbox_b = params
    x = jnp.transpose(x_nchw, (0, 2, 3, 1))  # NHWC
    dn = ("NHWC", "HWIO", "NHWC")
    mid = lax.conv_general_dilated(x, wconv, (1, 1), "SAME", dimension_numbers=dn)
    mid = mid + bconv.reshape(1, 1, 1, -1)
    logits = lax.conv_general_dilated(mid, wcls.reshape(1, 1, *wcls.shape), (1, 1), "VALID",
                                      dimension_numbers=dn) + bcls.reshape(1, 1, 1, -1)
    box = lax.conv_general_dilated(mid, wbox.reshape(1, 1, *wbox.shape), (1, 1), "VALID",
                                   dimension_numbers=dn) + bbox_b.reshape(1, 1, 1, -1)
    return jnp.transpose(logits, (0, 3, 1, 2)), jnp.transpose(box, (0, 3, 1, 2))


def init_params(key, feature_channels, mid_channels, num_anchors):
    """Deterministic synthetic parameter init (HWIO conv layout)."""
    k1, k2, k3, k4, k5, k6 = jax.random.split(key, 6)
    wconv = jax.random.normal(k1, (3, 3, feature_channels, mid_channels), jnp.float32) * 0.05
    bconv = jax.random.normal(k2, (1, mid_channels), jnp.float32) * 0.01
    wcls = jax.random.normal(k3, (mid_channels, num_anchors * 2), jnp.float32) * 0.05
    bcls = jax.random.normal(k4, (1, num_anchors * 2), jnp.float32) * 0.01
    wbox = jax.random.normal(k5, (mid_channels, num_anchors * 4), jnp.float32) * 0.05
    bbox_b = jax.random.normal(k6, (1, num_anchors * 4), jnp.float32) * 0.01
    return (wconv, bconv, wcls, bcls, wbox, bbox_b)


if __name__ == "__main__":
    # Module configuration (small, consistent with RPN.__init__):
    anchor_scales = (8, 16, 32)
    anchor_ratios = (0.5, 1.0, 2.0)
    num_anchors = len(anchor_scales) * len(anchor_ratios)  # 9
    feature_channels = 16
    mid_channels = 32

    N, H, W = 2, 8, 8
    key = jax.random.PRNGKey(0)
    x = jax.random.normal(key, (N, feature_channels, H, W), jnp.float32)

    params = init_params(jax.random.PRNGKey(1), feature_channels, mid_channels, num_anchors)

    logits, bbox = rpn_forward(x, params)
    logits, bbox = jax.block_until_ready((logits, bbox))

    assert logits.shape == (N, num_anchors * 2, H, W)
    assert bbox.shape == (N, num_anchors * 4, H, W)

    ref_logits, ref_bbox = _reference_forward(x, params)
    assert jnp.allclose(logits, ref_logits, rtol=1e-4, atol=1e-4)
    assert jnp.allclose(bbox, ref_bbox, rtol=1e-4, atol=1e-4)

    print("KERNEL_OK")
</pallas_src>

<mosaic_0001>
module attributes {stable_mosaic.version = 11 : i64} {
  func.func @_rpn_kernel(%arg0: i32, %arg1: i32, %arg2: memref<1x64x144xf32, #tpu.memory_space<vmem>>, %arg3: memref<144x128xf32, #tpu.memory_space<vmem>>, %arg4: memref<1x128xf32, #tpu.memory_space<vmem>>, %arg5: memref<128x128xf32, #tpu.memory_space<vmem>>, %arg6: memref<1x128xf32, #tpu.memory_space<vmem>>, %arg7: memref<1x64x128xf32, #tpu.memory_space<vmem>>) attributes {dimension_semantics = [#tpu.dimension_semantics<parallel>, #tpu.dimension_semantics<parallel>], iteration_bounds = array<i64: 2, 1>, scalar_prefetch = 0 : i64, scratch_operands = 0 : i64, tpu.core_type = #tpu.core_type<tc>, window_params = [{transform_indices = @transform_0, window_bounds = array<i64: 1, 64, 144>}, {pipeline_mode = #tpu.pipeline_mode<synchronous>, transform_indices = @transform_1, window_bounds = array<i64: 144, 128>}, {pipeline_mode = #tpu.pipeline_mode<synchronous>, transform_indices = @transform_2, window_bounds = array<i64: 1, 128>}, {pipeline_mode = #tpu.pipeline_mode<synchronous>, transform_indices = @transform_3, window_bounds = array<i64: 128, 128>}, {pipeline_mode = #tpu.pipeline_mode<synchronous>, transform_indices = @transform_4, window_bounds = array<i64: 1, 128>}, {transform_indices = @transform_5, window_bounds = array<i64: 1, 64, 128>}]} {
    %c0 = arith.constant 0 : index
    %c0_0 = arith.constant 0 : index
    %c0_1 = arith.constant 0 : index
    %0 = vector.load %arg2[%c0, %c0_0, %c0_1] : memref<1x64x144xf32, #tpu.memory_space<vmem>>, vector<1x64x144xf32>
    %1 = vector.shape_cast %0 : vector<1x64x144xf32> to vector<64x144xf32>
    %c0_2 = arith.constant 0 : index
    %c0_3 = arith.constant 0 : index
    %2 = vector.load %arg3[%c0_2, %c0_3] : memref<144x128xf32, #tpu.memory_space<vmem>>, vector<144x128xf32>
    %cst = arith.constant dense<0.000000e+00> : vector<64x128xf32>
    %3 = tpu.matmul %1, %2, %cst {dimension_numbers = #tpu.dot_dimension_numbers<[1], [0], [0], [1], [0, 0, 1, 1], [], []>} : vector<64x144xf32>, vector<144x128xf32>, vector<64x128xf32> -> vector<64x128xf32>
    %c0_4 = arith.constant 0 : index
    %c0_5 = arith.constant 0 : index
    %4 = vector.load %arg4[%c0_4, %c0_5] : memref<1x128xf32, #tpu.memory_space<vmem>>, vector<1x128xf32>
    %5 = vector.broadcast %4 : vector<1x128xf32> to vector<64x128xf32>
    %6 = arith.addf %3, %5 : vector<64x128xf32>
    %c0_6 = arith.constant 0 : index
    %c0_7 = arith.constant 0 : index
    %7 = vector.load %arg5[%c0_6, %c0_7] : memref<128x128xf32, #tpu.memory_space<vmem>>, vector<128x128xf32>
    %cst_8 = arith.constant dense<0.000000e+00> : vector<64x128xf32>
    %8 = tpu.matmul %6, %7, %cst_8 {dimension_numbers = #tpu.dot_dimension_numbers<[1], [0], [0], [1], [0, 0, 1, 1], [], []>} : vector<64x128xf32>, vector<128x128xf32>, vector<64x128xf32> -> vector<64x128xf32>
    %c0_9 = arith.constant 0 : index
    %c0_10 = arith.constant 0 : index
    %9 = vector.load %arg6[%c0_9, %c0_10] : memref<1x128xf32, #tpu.memory_space<vmem>>, vector<1x128xf32>
    %10 = vector.broadcast %9 : vector<1x128xf32> to vector<64x128xf32>
    %11 = arith.addf %8, %10 : vector<64x128xf32>
    %c0_11 = arith.constant 0 : index
    %c0_12 = arith.constant 0 : index
    %c0_13 = arith.constant 0 : index
    %12 = vector.load %arg7[%c0_11, %c0_12, %c0_13] : memref<1x64x128xf32, #tpu.memory_space<vmem>>, vector<1x64x128xf32>
    %13 = vector.shape_cast %12 : vector<1x64x128xf32> to vector<64x128xf32>
    %14 = vector.shape_cast %11 : vector<64x128xf32> to vector<1x64x128xf32>
    tpu.vector_store %arg7[%c0_11, %c0_12, %c0_13], %14 {strides = array<i32>} : memref<1x64x128xf32, #tpu.memory_space<vmem>>, vector<1x64x128xf32>,
    return
  }
  func.func @transform_0(%arg0: i32, %arg1: i32) -> (i32, i32, i32) {
    %c0_i32 = arith.constant 0 : i32
    %c0_i32_0 = arith.constant 0 : i32
    return %arg0, %arg1, %c0_i32 : i32, i32, i32
  }
  func.func @transform_1(%arg0: i32, %arg1: i32) -> (i32, i32) {
    %c0_i32 = arith.constant 0 : i32
    %c0_i32_0 = arith.constant 0 : i32
    %c0_i32_1 = arith.constant 0 : i32
    return %c0_i32, %c0_i32_0 : i32, i32
  }
  func.func @transform_2(%arg0: i32, %arg1: i32) -> (i32, i32) {
    %c0_i32 = arith.constant 0 : i32
    %c0_i32_0 = arith.constant 0 : i32
    %c0_i32_1 = arith.constant 0 : i32
    return %c0_i32, %c0_i32_0 : i32, i32
  }
  func.func @transform_3(%arg0: i32, %arg1: i32) -> (i32, i32) {
    %c0_i32 = arith.constant 0 : i32
    %c0_i32_0 = arith.constant 0 : i32
    %c0_i32_1 = arith.constant 0 : i32
    return %c0_i32, %c0_i32_0 : i32, i32
  }
  func.func @transform_4(%arg0: i32, %arg1: i32) -> (i32, i32) {
    %c0_i32 = arith.constant 0 : i32
    %c0_i32_0 = arith.constant 0 : i32
    %c0_i32_1 = arith.constant 0 : i32
    return %c0_i32, %c0_i32_0 : i32, i32
  }
  func.func @transform_5(%arg0: i32, %arg1: i32) -> (i32, i32, i32) {
    %c0_i32 = arith.constant 0 : i32
    %c0_i32_0 = arith.constant 0 : i32
    return %arg0, %arg1, %c0_i32 : i32, i32, i32
  }
}

</mosaic_0001>

<bundles_post_ra>
// kernel: tpu_custom_call.1
= control target key start
LH: loop header
LB: loop body
LE: loop exit
PB: predicated region body
PF: predicated region fallthrough
CT: control target
= control target key end

     0   :  { %10 = vsyncpa [#allocation3], 0  ;;  %s1482_s0 = inlined_call_operand.hbm [shape: f32[2,64,144], index: 0, kind: input, shape index: {}]   ;;  %s1483_s1 = inlined_call_operand.hbm [shape: f32[144,128], index: 1, kind: input, shape index: {}]   ;;  %s1484_s2 = inlined_call_operand.vmem [shape: f32[1,128], index: 2, kind: input, shape index: {}]   ;;  %s1485_s3 = inlined_call_operand.hbm [shape: f32[128,128], index: 3, kind: input, shape index: {}]   ;;  %s1486_s4 = inlined_call_operand.vmem [shape: f32[1,128], index: 4, kind: input, shape index: {}]   ;;  %s1487_s5 = inlined_call_operand.hbm [shape: f32[2,64,128], index: 5, kind: output, shape index: {}]  }
   0x1   :  { %12 = vsyncpa [#allocation3 + $0x1], 0 }
   0x2   :  { %13 = vsyncpa [#allocation6], 0 }
   0x3   :  { %14 = vsyncpa [#allocation4], 0 }
   0x4   :  { %16 = vsyncpa [#allocation4 + $0x1], 0  ;;  %s1185_s18 = smov 0   ;;  %s1187_s19 = smov 0  }
   0x5   :  { %s1189_s20 = smov 0   ;;  %s1191_s21 = smov 0  }
   0x6   :  { %s1193_s22 = smov 0   ;;  %s1195_s23 = smov 0  }
   0x7 LB: > { %s722_s24 = sadd.s32 4294967295, %s1142_s23   ;;  %s723_s25 = sadd.s32 4294967294, %s1142_s23   ;;  %s1142_s23 = sphi %s1195_s23, %s22_s23   ;;  %s1138_s22 = sphi %s1193_s22, %s1509_s22   ;;  %s1134_s21 = sphi %s1191_s21, %s1508_s21   ;;  %s1130_s20 = sphi %s1189_s20, %s1507_s20   ;;  %s1126_s19 = sphi %s1187_s19, %s1506_s19   ;;  %s1122_s18 = sphi %s1185_s18, %s1505_s18  }
   0x8   : > { %p56_p0 = scmp.ne.s32.totalorder %s1126_s19, %s1122_s18  ;;  %p1219_p1 = scmp.eq.s32.totalorder %s722_s24, 0 }
   0x9   : > { %p1223_p2 = scmp.eq.s32.totalorder %s722_s24, 1  ;;  %p172_p3 = scmp.eq.s32.totalorder %s723_s25, 1 }
   0xa   : > { %s1492_s26 = scalar_select %p1219_p1, 1, 0 }
   0xb   : > { %p1229_p4 = por %p1219_p1, %p56_p0  ;;  %p724_p5 = scmp.ge.s32.totalorder %s1142_s23, 1 }
   0xc   : > { %p1234_p6 = por %p172_p3, %p56_p0  ;;  %p179_p7 = scmp.lt.s32.totalorder %s1142_s23, 3 }
   0xd   : > { %s1494_s28 = scalar_select %p1229_p4, 1, 0 }
   0xe   : > { %s1495_s29 = scalar_select %p1234_p6, 1, 0 }
   0xf   : > { %p1239_p8 = pnand %p724_p5, %p179_p7  ;;  %s1144_s6 = smov [#allocation5]  }
  0x10   : > { %s191_s7 = sshll.u32 %s1144_s6, 4  ;;  %s1145_s9 = smov [#allocation7]   ;;  %s1243_s7 = int_to_ptr.vmem [resolvable:$true] %s191_s7 }
  0x11   : > { %p892_p9 = pneg %p1239_p8  ;;  %s207_s10 = sshll.u32 %s1145_s9, 4  ;;  %s1254_s10 = int_to_ptr.vmem [resolvable:$true] %s207_s10 }
  0x12   : > { %s970_s13 = scalar_lea.hbm %s1483_s1, 2304 }
  0x13   : > { %p1250_p11 = pnand %p892_p9, %p1219_p1  ;;  %p971_p12 = scmp.ne.s32.totalorder %s1483_s1, %s970_s13 }
  0x14   : > { %p977_p5 = scmp.lt.u32.totalorder %s970_s13, %s1483_s1 }
  0x15   : > { %p972_p13 = pneg %p1250_p11 }
  0x17   : > { %p973_p0 = pnand %p972_p13, %p971_p12 }
  0x19   : > { %p974_p3 = pneg %p973_p0 }
  0x1b   : > { %p979_p7 = pnand %p977_p5, %p974_p3 }
  0x1d   : > { %982 = shalt.err (!%p979_p7)
}
  0x1e   : > { %s983_s24 = scalar_lea.vmem %s1243_s7, 2304  ;;  %p991_p1 = scmp.lt.s32.totalorder %s1243_s7, %s1243_s7 }
  0x1f   : > { %p984_p9 = scmp.ne.s32.totalorder %s1243_s7, %s983_s24  ;;  %p992_p12 = scmp.lt.s32.totalorder %s983_s24, %s983_s24 }
  0x21   : > { %p986_p10 = pnand %p984_p9, %p972_p13  ;;  %p993_p0 = por %p992_p12, %p991_p1 }
  0x23   : > { %p987_p6 = pneg %p986_p10 }
  0x25   : > { %p994_p4 = pnand %p993_p0, %p987_p6 }
  0x27   : > { %997 = shalt.err (!%p994_p4)
}
  0x28   : > { %s1146_s25 = smov 128   ;;  %s1147_s6 = smov 8  }
  0x29   : > { %895 = dma.hbm_to_vmem [thread:$0]  (!%p1250_p11), %s1483_s1, 2304, %s1243_s7, [#allocation6], %s1146_s25, %s1146_s25, %s1147_s6  }
  0x2a   : > { %s998_s14 = scalar_lea.hbm %s1485_s3, 2048 }
  0x2b   : > { %p999_p1 = scmp.ne.s32.totalorder %s1485_s3, %s998_s14  ;;  %p1005_p10 = scmp.lt.u32.totalorder %s998_s14, %s1485_s3 }
  0x2d   : > { %p1001_p4 = pnand %p999_p1, %p972_p13 }
  0x2f   : > { %p1002_p6 = pneg %p1001_p4 }
  0x31   : > { %p1007_p3 = pnand %p1005_p10, %p1002_p6 }
  0x33   : > { %1010 = shalt.err (!%p1007_p3)
}
  0x34   : > { %s1011_s7 = scalar_lea.vmem %s1254_s10, 2048  ;;  %p1019_p12 = scmp.lt.s32.totalorder %s1254_s10, %s1254_s10 }
  0x35   : > { %p1012_p5 = scmp.ne.s32.totalorder %s1254_s10, %s1011_s7  ;;  %p1020_p0 = scmp.lt.s32.totalorder %s1011_s7, %s1011_s7 }
  0x37   : > { %p1014_p7 = pnand %p1012_p5, %p972_p13  ;;  %p1021_p1 = por %p1020_p0, %p1019_p12 }
  0x39   : > { %p1015_p9 = pneg %p1014_p7 }
  0x3b   : > { %p1022_p4 = pnand %p1021_p1, %p1015_p9 }
  0x3d   : > { %1025 = shalt.err (!%p1022_p4)
}
  0x3e   : > { %898 = dma.hbm_to_vmem [thread:$0]  (!%p1250_p11), %s1485_s3, 2048, %s1254_s10, [#allocation6], %s1146_s25, %s1146_s25, %s1147_s6  }
  0x3f   : > { %s34_s12 = sadd.s32 1, %s1138_s22  ;;  %s43_s13 = sadd.s32 1, %s1130_s20 }
  0x40   : > { %p36_p13 = scmp.ge.s32.totalorder %s34_s12, 2  ;;  %p50_p6 = scmp.ne.s32.totalorder %s1130_s20, %s1126_s19 }
  0x41   : > { %p51_p10 = scmp.eq.s32.totalorder %s1142_s23, 0  ;;  %p909_p3 = scmp.lt.s32.totalorder %s1142_s23, 2 }
  0x42   : > { %s1511_s12 = smov (%p36_p13, %s34_s12), 0  ;;  %p1318_p7 = por %p1223_p2, %p50_p6 }
  0x43   : > { %p52_p5 = por %p51_p10, %p50_p6  ;;  %s38_s14 = ssub.s32 %s1138_s22, %s1511_s12 }
  0x44   : > { %s1498_s8 = scalar_select %p1318_p7, 1, 0 }
  0x45   : > { %s224_s15 = sand.u32 1, %s1130_s20   ;;  %p41_p9 = scmp.eq.s32.totalorder %s38_s14, 0 }
  0x46   : > { %s728_s10 = sshll.u32 %s224_s15, 7  ;;  %s751_s25 = sshll.u32 %s1138_s22, 11 }
  0x47   : > { %s1327_s6 = scalar_select %p41_p9, %s1130_s20, %s43_s13  }
  0x48   : > { %s1332_s24 = scalar_lea.hbm %s1482_s0, %s751_s25  ;;  %s228_s27 = scalar_lea.vmem [#allocation2], %s728_s10 }
  0x49   : > { %s238_s7 = sshll.u32 %s228_s27, 4  ;;  %p1336_p2 = pnand %p909_p3, %p52_p5  ;;  %s1340_s7 = int_to_ptr.vmem [resolvable:$true] %s238_s7 }
  0x4a   : > { %s1342_s11 = scalar_lea.sflag [#allocation3], %s224_s15  ;;  %s1026_s13 = scalar_lea.hbm %s1332_s24, 2048 }
  0x4b   : > { %p1027_p11 = scmp.ne.s32.totalorder %s1332_s24, %s1026_s13  ;;  %p1028_p12 = pneg %p1336_p2 }
  0x4c   : > { %s1031_s25 = scalar_lea.hbm %s1482_s0, 4096  ;;  %p1032_p4 = scmp.lt.u32.totalorder %s1332_s24, %s1482_s0 }
  0x4d   : > { %p1029_p0 = pnand %p1028_p12, %p1027_p11  ;;  %p1033_p13 = scmp.lt.u32.totalorder %s1031_s25, %s1026_s13 }
  0x4e   : > { %p1035_p10 = scmp.lt.u32.totalorder %s1026_s13, %s1332_s24 }
  0x4f   : > { %p1030_p1 = pneg %p1029_p0  ;;  %p1034_p6 = por %p1033_p13, %p1032_p4 }
  0x51   : > { %p1036_p3 = por %p1035_p10, %p1034_p6 }
  0x53   : > { %p1037_p5 = pnand %p1036_p3, %p1030_p1 }
  0x55   : > { %1040 = shalt.err (!%p1037_p5)
}
  0x56   : > { %s1041_s15 = scalar_lea.vmem %s1340_s7, 2048  ;;  %s1148_s27 = smov [#allocation2]  }
  0x57   : > { %p1042_p9 = scmp.ne.s32.totalorder %s1340_s7, %s1041_s15  ;;  %s1046_s14 = sshll.u32 %s1148_s27, 4  ;;  %s1047_s14 = int_to_ptr.vmem [resolvable:$false] %s1046_s14 }
  0x58   : > { %s1048_s10 = scalar_lea.vmem %s1047_s14, 4096  ;;  %p1049_p7 = scmp.lt.s32.totalorder %s1340_s7, %s1047_s14 }
  0x59   : > { %p1044_p11 = pnand %p1042_p9, %p1028_p12  ;;  %p1050_p4 = scmp.lt.s32.totalorder %s1048_s10, %s1041_s15 }
  0x5b   : > { %p1045_p0 = pneg %p1044_p11  ;;  %p1051_p13 = por %p1050_p4, %p1049_p7 }
  0x5d   : > { %p1052_p6 = pnand %p1051_p13, %p1045_p0 }
  0x5f   : > { %1055 = shalt.err (!%p1052_p6)
}
  0x60   : > { %s1149_s13 = smov 256   ;;  %s1150_s25 = smov 16  }
  0x61   : > { %902 = dma.hbm_to_vmem [thread:$0]  (!%p1336_p2), %s1332_s24, 2048, %s1340_s7, %s1342_s11, %s1149_s13, %s1149_s13, %s1150_s25  }
  0x62   : > { %250 = sbr.rel (%p1239_p8) target bundleno = 619 (0x26b), region = 40  ;;  %s1373_s16 = sand.u32 (!%p1239_p8), 1, %s1126_s19  }
  0x63   : > { %s732_s17 = sshll.u32 (!%p1239_p8), %s1373_s16, 7  ;;  %s253_s15 = scalar_lea.sflag (!%p1239_p8), [#allocation3], %s1373_s16 }
  0x64   : > { %s1377_s27 = scalar_lea.vmem (!%p1239_p8), [#allocation2], %s732_s17  ;;  %p1500_p7 = scmp.ne.s32.totalorder (!%p1239_p8), %s1494_s28, 0 }
  0x69   : > { %1109 = dma.done.wait (%p1500_p7), %s253_s15, 2048  }
  0x6a   : > { %1111 = vsyncadd (%p1500_p7), %s253_s15, 4294965248  ;;  %p1501_p2 = scmp.ne.s32.totalorder %s1492_s26, 0 }
  0x6c   : > { %1113 = dma.done.wait (%p1501_p2), [#allocation6], 4352  }
  0x6d   : > { %1115 = vsyncadd (%p1501_p2), [#allocation6], 4294962944  ;;  %v1151_v0 = vmov 0.0|0.0   ;;  %v309_v1 = vld [vmem:[#allocation5] sm:$0xff]  ;;  %v310_v2 = vld [vmem:[#allocation5 + $0x8] sm:$0xff]  ;;  %vm334_vm0 = vcmask 130048  }
  0x6e   : > { %821 = vmatprep.subr.bf16.mxu0 %v1151_v0  ;;  %v311_v3 = vld [vmem:[#allocation5 + $0x10] sm:$0xff]  ;;  %v822_v4 = vpack.c.bf16 %v310_v2, %v309_v1  ;;  %v312_v5 = vld [vmem:[#allocation5 + $0x18] sm:$0xff]  ;;  %v313_v7 = vld [vmem:[#allocation5 + $0x20] sm:$0xff]  ;;  %s735_s30 = sshll.u32 %s1373_s16, 6  ;;  %s752_s14 = sshll.u32 %s1134_s21, 10 }
  0x6f   : > { %v825_v6 = vpack.c.bf16 %v312_v5, %v311_v3  ;;  %v314_v8 = vld [vmem:[#allocation5 + $0x28] sm:$0xff]  ;;  %v315_v11 = vld [vmem:[#allocation5 + $0x30] sm:$0xff]  ;;  %v316_v12 = vld [vmem:[#allocation5 + $0x38] sm:$0xff]  ;;  %s290_s9 = scalar_lea.vmem [#allocation8], %s735_s30  ;;  %s1433_s25 = scalar_lea.hbm %s1487_s5, %s752_s14 }
  0x70   : > { %823 = vmatpush1.bf16.msra.mxu0 %v822_v4  ;;  %v294_v9 = vld [vmem:[%s1377_s27 + $0x8] sm:$0xff]  ;;  %v828_v10 = vpack.c.bf16 %v314_v8, %v313_v7  ;;  %v831_v13 = vpack.c.bf16 %v316_v12, %v315_v11  ;;  %v317_v14 = vld [vmem:[#allocation5 + $0x40] sm:$0xff]  ;;  %v464_v15 = vld [vmem:[#allocation7] sm:$0xff]  ;;  %s616_s11 = sshll.u32 %s290_s9, 4  ;;  %s601_s17 = scalar_lea.sflag [#allocation4], %s1373_s16  ;;  %s1428_s11 = int_to_ptr.vmem [resolvable:$true] %s616_s11 }
  0x71   : > { %824 = vmatprep.subr.bf16.mxu0 %v1151_v0  ;;  %737 = vmatprep.mubr.msk.f32.mxu0 %vm334_vm0, %v294_v9  ;;  %v465_v16 = vld [vmem:[#allocation7 + $0x8] sm:$0xff]  ;;  %v318_v17 = vld [vmem:[#allocation5 + $0x48] sm:$0xff]  ;;  %v466_v19 = vld [vmem:[#allocation7 + $0x10] sm:$0xff]  ;;  %s1056_s15 = scalar_lea.vmem %s1428_s11, 1024  ;;  %p1502_p12 = scmp.ne.s32.totalorder %s1498_s8, 0 }
  0x72   : > { %v848_v18 = vpack.c.bf16 %v465_v16, %v464_v15  ;;  %v467_v20 = vld [vmem:[#allocation7 + $0x18] sm:$0xff]  ;;  %v468_v22 = vld [vmem:[#allocation7 + $0x20] sm:$0xff]  ;;  %v469_v23 = vld [vmem:[#allocation7 + $0x28] sm:$0xff]  ;;  %v834_v24 = vpack.c.bf16 %v318_v17, %v317_v14  ;;  %p1057_p8 = scmp.ne.s32.totalorder %s1428_s11, %s1056_s15  ;;  %s1152_s21 = smov [#allocation8]  }
  0x73   : > { %v852_v21 = vpack.c.bf16 %v467_v20, %v466_v19  ;;  %v319_v25 = vld [vmem:[#allocation5 + $0x50] sm:$0xff]  ;;  %v320_v26 = vld [vmem:[#allocation5 + $0x58] sm:$0xff]  ;;  %v856_v27 = vpack.c.bf16 %v469_v23, %v468_v22  ;;  %v470_v28 = vld [vmem:[#allocation7 + $0x30] sm:$0xff] }
  0x74   : > { %826 = vmatpush1.bf16.msra.mxu0 %v825_v6  ;;  %849 = vmatprep.subr.bf16.mxu1 %v848_v18  ;;  %v471_v29 = vld [vmem:[#allocation7 + $0x38] sm:$0xff]  ;;  %v837_v30 = vpack.c.bf16 %v320_v26, %v319_v25  ;;  %v321_v31 = vld [vmem:[#allocation5 + $0x60] sm:$0xff]  ;;  %v472_v34 = vld [vmem:[#allocation7 + $0x40] sm:$0xff]  ;;  %p1058_p1 = pnand %p1057_p8, %p1502_p12 }
  0x75   : > { %827 = vmatprep.subr.bf16.mxu0 %v1151_v0  ;;  %851 = vmatpush3.bf16.msra.mxu1 %v848_v18  ;;  %v322_v32 = vld [vmem:[#allocation5 + $0x68] sm:$0xff]  ;;  %v860_v33 = vpack.c.bf16 %v471_v29, %v470_v28  ;;  %v473_v35 = vld [vmem:[#allocation7 + $0x48] sm:$0xff]  ;;  %v323_v37 = vld [vmem:[#allocation5 + $0x70] sm:$0xff] }
  0x76   : > { %853 = vmatprep.subr.bf16.mxu1 %v852_v21  ;;  %v840_v36 = vpack.c.bf16 %v322_v32, %v321_v31  ;;  %v324_v38 = vld [vmem:[#allocation5 + $0x78] sm:$0xff]  ;;  %v864_v39 = vpack.c.bf16 %v473_v35, %v472_v34  ;;  %v474_v40 = vld [vmem:[#allocation7 + $0x50] sm:$0xff]  ;;  %v475_v41 = vld [vmem:[#allocation7 + $0x58] sm:$0xff]  ;;  %p1059_p10 = pneg %p1058_p1 }
  0x77   : > { %v843_v42 = vpack.c.bf16 %v324_v38, %v323_v37  ;;  %v325_v43 = vld [vmem:[#allocation5 + $0x80] sm:$0xff]  ;;  %v326_v44 = vld [vmem:[#allocation5 + $0x88] sm:$0xff]  ;;  %v868_v45 = vpack.c.bf16 %v475_v41, %v474_v40  ;;  %v476_v46 = vld [vmem:[#allocation7 + $0x60] sm:$0xff] }
  0x78   : > { %829 = vmatpush1.bf16.msra.mxu0 %v828_v10  ;;  %v477_v47 = vld [vmem:[#allocation7 + $0x68] sm:$0xff]  ;;  %v846_v48 = vpack.c.bf16 %v326_v44, %v325_v43  ;;  %v293_v50 = vld [vmem:[%s1377_s27] sm:$0xff]  ;;  %v295_v52 = vld [vmem:[%s1377_s27 + $0x10] sm:$0xff] }
  0x79   : > { %830 = vmatprep.subr.bf16.mxu0 %v1151_v0  ;;  %855 = vmatpush3.bf16.msra.mxu1 %v852_v21  ;;  %v872_v49 = vpack.c.bf16 %v477_v47, %v476_v46  ;;  %v296_v51 = vld [vmem:[%s1377_s27 + $0x18] sm:$0xff]  ;;  %v298_v53 = vld [vmem:[%s1377_s27 + $0x28] sm:$0xff]  ;;  %v297_v54 = vld [vmem:[%s1377_s27 + $0x20] sm:$0xff] }
  0x7a   : > { %857 = vmatprep.subr.bf16.mxu1 %v856_v27  ;;  %v300_v55 = vld [vmem:[%s1377_s27 + $0x38] sm:$0xff]  ;;  %v299_v56 = vld [vmem:[%s1377_s27 + $0x30] sm:$0xff]  ;;  %v302_v57 = vld [vmem:[%s1377_s27 + $0x48] sm:$0xff] }
  0x7b   : > { %v301_v58 = vld [vmem:[%s1377_s27 + $0x40] sm:$0xff]  ;;  %v304_v59 = vld [vmem:[%s1377_s27 + $0x58] sm:$0xff]  ;;  %v303_v60 = vld [vmem:[%s1377_s27 + $0x50] sm:$0xff] }
  0x7c   : > { %832 = vmatpush1.bf16.msra.mxu0 %v831_v13  ;;  %v306_v61 = vld [vmem:[%s1377_s27 + $0x68] sm:$0xff]  ;;  %v305_v62 = vld [vmem:[%s1377_s27 + $0x60] sm:$0xff]  ;;  %v308_v63 = vld [vmem:[%s1377_s27 + $0x78] sm:$0xff] }
  0x7d   : > { %833 = vmatprep.subr.bf16.mxu0 %v1151_v0  ;;  %859 = vmatpush3.bf16.msra.mxu1 %v856_v27  ;;  %v478_v1 = vld [vmem:[#allocation7 + $0x70] sm:$0xff]  ;;  %v479_v2 = vld [vmem:[#allocation7 + $0x78] sm:$0xff] }
  0x7e   : > { %861 = vmatprep.subr.bf16.mxu1 %v860_v33  ;;  %v876_v3 = vpack.c.bf16 %v479_v2, %v478_v1  ;;  %v736_v4 = vld [vmem:[%s1484_s2] ss:$0 sm:$0xff] }
  0x7f   : > { %v745_v29 = vld [vmem:[%s1486_s4] ss:$0 sm:$0xff] }
  0x80   : > { %835 = vmatpush1.bf16.msra.mxu0 %v834_v24 }
  0x81   : > { %836 = vmatprep.subr.bf16.mxu0 %v1151_v0  ;;  %863 = vmatpush3.bf16.msra.mxu1 %v860_v33 }
  0x82   : > { %865 = vmatprep.subr.bf16.mxu1 %v864_v39 }
  0x84   : > { %838 = vmatpush1.bf16.msra.mxu0 %v837_v30 }
  0x85   : > { %839 = vmatprep.subr.bf16.mxu0 %v1151_v0  ;;  %867 = vmatpush3.bf16.msra.mxu1 %v864_v39 }
  0x86   : > { %869 = vmatprep.subr.bf16.mxu1 %v868_v45 }
  0x88   : > { %841 = vmatpush1.bf16.msra.mxu0 %v840_v36 }
  0x89   : > { %842 = vmatprep.subr.bf16.mxu0 %v1151_v0  ;;  %871 = vmatpush3.bf16.msra.mxu1 %v868_v45 }
  0x8a   : > { %873 = vmatprep.subr.bf16.mxu1 %v872_v49 }
  0x8c   : > { %844 = vmatpush1.bf16.msra.mxu0 %v843_v42 }
  0x8d   : > { %845 = vmatprep.subr.bf16.mxu0 %v1151_v0  ;;  %875 = vmatpush3.bf16.msra.mxu1 %v872_v49  ;;  %v307_v0 = vld [vmem:[%s1377_s27 + $0x70] sm:$0xff]  ;;  %s1060_s27 = sshll.u32 %s1152_s21, 4  ;;  %s1061_s27 = int_to_ptr.vmem [resolvable:$false] %s1060_s27 }
  0x8e   : > { %877 = vmatprep.subr.bf16.mxu1 %v876_v3  ;;  %s1062_s26 = scalar_lea.vmem %s1061_s27, 2048  ;;  %p1063_p3 = scmp.lt.s32.totalorder %s1428_s11, %s1061_s27 }
  0x8f   : > { %p1064_p5 = scmp.lt.s32.totalorder %s1062_s26, %s1056_s15 }
  0x90   : > { %847 = vmatpush1.bf16.msra.mxu0 %v846_v48 }
  0x91   : > { %879 = vmatpush3.bf16.msra.mxu1 %v876_v3  ;;  %p1065_p9 = por %p1064_p5, %p1063_p3 }
  0x93   : > { %424 = vmatmul.mubr.f32.vlgmr.msra.gmra.mrb[0].mxu0 %v293_v50  ;;  %p1066_p11 = pnand %p1065_p9, %p1059_p10 }
  0x94   : > { %738 = vmatprep.mubr.msk.f32.mxu0 %vm334_vm0, %v296_v51 }
  0x97   : > { %429 = vmatmul.mubr.f32.gmra.mrb[2].mxu0 %v295_v52 }
  0x98   : > { %739 = vmatprep.mubr.msk.f32.mxu0 %vm334_vm0, %v298_v53 }
  0x9b   : > { %434 = vmatmul.mubr.f32.gmra.mrb[4].mxu0 %v297_v54 }
  0x9c   : > { %740 = vmatprep.mubr.msk.f32.mxu0 %vm334_vm0, %v300_v55 }
  0x9f   : > { %439 = vmatmul.mubr.f32.gmra.mrb[6].mxu0 %v299_v56 }
  0xa0   : > { %741 = vmatprep.mubr.msk.f32.mxu0 %vm334_vm0, %v302_v57 }
  0xa3   : > { %444 = vmatmul.mubr.f32.gmra.mrb[8].mxu0 %v301_v58 }
  0xa4   : > { %742 = vmatprep.mubr.msk.f32.mxu0 %vm334_vm0, %v304_v59 }
  0xa7   : > { %449 = vmatmul.mubr.f32.gmra.mrb[10].mxu0 %v303_v60 }
  0xa8   : > { %743 = vmatprep.mubr.msk.f32.mxu0 %vm334_vm0, %v306_v61 }
  0xab   : > { %454 = vmatmul.mubr.f32.gmra.mrb[12].mxu0 %v305_v62 }
  0xac   : > { %744 = vmatprep.mubr.msk.f32.mxu0 %vm334_vm0, %v308_v63 }
  0xaf   : > { %459 = vmatmul.mubr.f32.gmra.mrb[14].mxu0 %v307_v0 }
 0x166   : > { %v425_v5 = vpop.f32.mrb[0].mxu0 }
 0x167   : > { %v427_v6 = vpop.f32.mrb[1].mxu0  ;;  %v426_v7 = vadd.f32 %v736_v4, %v425_v5 }
 0x169   : > { %809 = vmatprep.mubr.f32.mxu1 %v426_v7 }
 0x16a   : > { %v430_v8 = vpop.f32.mrb[2].mxu0 }
 0x16b   : > { %v431_v9 = vadd.f32 %v736_v4, %v430_v8  ;;  %v432_v10 = vpop.f32.mrb[3].mxu0 }
 0x16d   : > { %810 = vmatmul.mubr.f32.vlgmr.msra.gmra.mrb[0].mxu1 %v431_v9 }
 0x16e   : > { %v435_v11 = vpop.f32.mrb[4].mxu0 }
 0x16f   : > { %v436_v12 = vadd.f32 %v736_v4, %v435_v11  ;;  %v437_v13 = vpop.f32.mrb[5].mxu0 }
 0x171   : > { %812 = vmatprep.mubr.f32.mxu1 %v436_v12 }
 0x172   : > { %v440_v14 = vpop.f32.mrb[6].mxu0 }
 0x173   : > { %v441_v15 = vadd.f32 %v736_v4, %v440_v14  ;;  %v442_v16 = vpop.f32.mrb[7].mxu0 }
 0x175   : > { %813 = vmatmul.mubr.f32.gmra.mrb[2].mxu1 %v441_v15 }
 0x176   : > { %v445_v17 = vpop.f32.mrb[8].mxu0 }
 0x177   : > { %v446_v18 = vadd.f32 %v736_v4, %v445_v17  ;;  %v447_v19 = vpop.f32.mrb[9].mxu0 }
 0x179   : > { %815 = vmatprep.mubr.f32.mxu1 %v446_v18 }
 0x17a   : > { %v450_v20 = vpop.f32.mrb[10].mxu0 }
 0x17b   : > { %v451_v21 = vadd.f32 %v736_v4, %v450_v20  ;;  %v452_v22 = vpop.f32.mrb[11].mxu0 }
 0x17d   : > { %816 = vmatmul.mubr.f32.gmra.mrb[4].mxu1 %v451_v21 }
 0x17e   : > { %v455_v23 = vpop.f32.mrb[12].mxu0 }
 0x17f   : > { %v456_v24 = vadd.f32 %v736_v4, %v455_v23  ;;  %v457_v25 = vpop.f32.mrb[13].mxu0 }
 0x181   : > { %818 = vmatprep.mubr.f32.mxu1 %v456_v24 }
 0x182   : > { %v460_v26 = vpop.f32.mrb[14].mxu0 }
 0x183   : > { %v461_v27 = vadd.f32 %v736_v4, %v460_v26  ;;  %v462_v28 = vpop.f32.mrb[15].mxu0 }
 0x185   : > { %819 = vmatmul.mubr.f32.gmra.mrb[6].mxu1 %v461_v27 }
 0x240   : > { %v811_v30 = vpop.f32.mrb[0].mxu1 }
 0x241   : > { %v559_v31 = vadd.f32 %v811_v30, %v745_v29  ;;  %v553_v32 = vpop.f32.mrb[1].mxu1 }
 0x242   : > { %v554_v33 = vadd.f32 %v745_v29, %v553_v32 }
 0x243   : > { %593 = vst [vmem:[%s290_s9 + $0x8] sm:$0xff] %v559_v31 }
 0x244   : > { %592 = vst [vmem:[%s290_s9] sm:$0xff] %v554_v33 }
 0x248   : > { %v814_v34 = vpop.f32.mrb[2].mxu1 }
 0x249   : > { %v569_v35 = vadd.f32 %v814_v34, %v745_v29  ;;  %v563_v36 = vpop.f32.mrb[3].mxu1 }
 0x24a   : > { %v564_v37 = vadd.f32 %v745_v29, %v563_v36 }
 0x24b   : > { %595 = vst [vmem:[%s290_s9 + $0x18] sm:$0xff] %v569_v35 }
 0x24c   : > { %594 = vst [vmem:[%s290_s9 + $0x10] sm:$0xff] %v564_v37 }
 0x250   : > { %v817_v38 = vpop.f32.mrb[4].mxu1 }
 0x251   : > { %v579_v39 = vadd.f32 %v817_v38, %v745_v29  ;;  %v573_v40 = vpop.f32.mrb[5].mxu1 }
 0x252   : > { %v574_v41 = vadd.f32 %v745_v29, %v573_v40 }
 0x253   : > { %597 = vst [vmem:[%s290_s9 + $0x28] sm:$0xff] %v579_v39 }
 0x254   : > { %596 = vst [vmem:[%s290_s9 + $0x20] sm:$0xff] %v574_v41 }
 0x258   : > { %v820_v42 = vpop.f32.mrb[6].mxu1 }
 0x259   : > { %v589_v43 = vadd.f32 %v820_v42, %v745_v29  ;;  %v583_v44 = vpop.f32.mrb[7].mxu1 }
 0x25a   : > { %v584_v45 = vadd.f32 %v745_v29, %v583_v44 }
 0x25b   : > { %599 = vst [vmem:[%s290_s9 + $0x38] sm:$0xff] %v589_v43 }
 0x25c   : > { %598 = vst [vmem:[%s290_s9 + $0x30] sm:$0xff] %v584_v45 }
 0x25d   : > { %1069 = shalt.err (!%p1066_p11)
}
 0x25e   : > { %s1070_s28 = scalar_lea.hbm %s1433_s25, 1024  ;;  %s1074_s7 = scalar_lea.hbm %s1487_s5, 2048 }
 0x25f   : > { %p1071_p0 = scmp.ne.s32.totalorder %s1433_s25, %s1070_s28  ;;  %p1075_p6 = scmp.lt.u32.totalorder %s1433_s25, %s1487_s5 }
 0x260   : > { %p1076_p7 = scmp.lt.u32.totalorder %s1074_s7, %s1070_s28  ;;  %p1078_p8 = scmp.lt.u32.totalorder %s1070_s28, %s1433_s25 }
 0x261   : > { %p1072_p4 = pnand %p1071_p0, %p1502_p12 }
 0x262   : > { %p1077_p2 = por %p1076_p7, %p1075_p6 }
 0x263   : > { %p1073_p13 = pneg %p1072_p4 }
 0x264   : > { %p1079_p1 = por %p1078_p8, %p1077_p2 }
 0x266   : > { %p1080_p10 = pnand %p1079_p1, %p1073_p13 }
 0x268   : > { %1083 = shalt.err (!%p1080_p10)
}
 0x269   : > { %s1153_s10 = smov 128   ;;  %s1154_s13 = smov 8  }
 0x26a   : > { %890 = dma.vmem_to_hbm [thread:$0]  (%p1502_p12), %s1428_s11, 1024, %s1433_s25, %s601_s17, %s1153_s10, %s1153_s10, %s1154_s13  }
 0x26b PF: > { %s631_s15 = sand.u32 1, %s1122_s18   ;;  %p1503_p3 = scmp.ne.s32.totalorder %s1495_s29, 0 }
 0x26c   : > { %p1504_p5 = scmp.ge.s32.totalorder %s1142_s23, 2  ;;  %s632_s21 = scalar_lea.sflag [#allocation4], %s631_s15 }
 0x26e   : > { %p904_p9 = pnand %p1504_p5, %p1503_p3 }
 0x270   : > { %1117 = dma.done.wait (!%p904_p9), %s632_s21, 1024  }
 0x271   : > { %1119 = vsyncadd (!%p904_p9), %s632_s21, 4294966272  ;;  %s22_s23 = sadd.s32 1, %s1142_s23   ;;  %s1505_s18 = smov %s1126_s19 }
 0x272   : > { %p19_p11 = scmp.ge.s32.totalorder %s22_s23, 4   ;;  %s1506_s19 = smov %s1130_s20 }
 0x273   : > { %s1507_s20 = smov %s1327_s6  ;;  %s1508_s21 = smov %s1138_s22 }
 0x274   : > { %s1509_s22 = smov %s1511_s12  ;;  %21 = sbr.rel (!%p19_p11) target bundleno = 7 (0x7), region = 93 }
 0x27b   :  { %637 = vsyncpa [#allocation3], 1 }
 0x27c   :  { %639 = vsyncpa [#allocation3 + $0x1], 1 }
 0x27d   :  { %640 = vsyncpa [#allocation6], 1 }
 0x27e   :  { %641 = vsyncpa [#allocation4], 1 }
 0x27f   :  { %643 = vsyncpa [#allocation4 + $0x1], 1 }

</bundles_post_ra>
